<compile_context>
chip_gen: v7x
topology: tpu7x:2x2x1
jax: 0.10.0
libtpu: 0.0.40
codegen_flags: <defaults>
</compile_context>

<pallas_src>
import functools

import jax
import jax.numpy as jnp
from jax import lax
from jax.experimental import pallas as pl
from jax.experimental.pallas import tpu as pltpu

LANES = 128
_MIB = 1 << 20


# ---------------------------------------------------------------------------
# Kernels
# ---------------------------------------------------------------------------
def attention_dense_kernel(x_ref, wblk_ref, b_ref, w2sel_ref, expand_ref, o_ref,
                           *, block_b, groups_per_seq, matmul_dtype=None):
    """Lane-dense path.

    x_ref      : (R, 128)   R = block_b * S / G; each row packs G = 128/F
                            consecutive sequence positions of one batch element.
    wblk_ref   : (128, G*A) block-diag(W1^T): per-position Linear on all lanes.
    b_ref      : (1, G*A)   bias tiled G times.
    w2sel_ref  : (G*A, G)   block-diag(w2): per-position score reduction.
    expand_ref : (G, 128)   0/1 matrix broadcasting a position's probability to
                            its F lanes (keeps the kernel free of lane reshapes).
    o_ref      : (R, 128)
    """
    xd = x_ref[...]                                                # (R, 128) f32
    xm = xd if matmul_dtype is None else xd.astype(matmul_dtype)
    wm = (wblk_ref[...] if matmul_dtype is None
          else wblk_ref[...].astype(matmul_dtype))

    # tanh(x @ W1^T + b1) for all G packed positions: one MXU matmul.
    h = jnp.tanh(
        jnp.dot(xm, wm, preferred_element_type=jnp.float32) + b_ref[...]
    )                                                              # (R, G*A)

    # Per-position attention score (w2 folded into a tiny MXU matmul).
    s = jnp.dot(h, w2sel_ref[...], preferred_element_type=jnp.float32)  # (R, G)

    # Softmax over the sequence axis, independently per batch element.
    # Leading-dim reshapes only; the lane dim (G) is never split or merged.
    s = s.reshape(block_b, groups_per_seq, -1)                     # (Bt, S/G, G)
    m = jnp.max(jnp.max(s, axis=2, keepdims=True), axis=1, keepdims=True)
    e = jnp.exp(s - m)
    denom = jnp.sum(jnp.sum(e, axis=2, keepdims=True), axis=1, keepdims=True)
    p = (e / denom).reshape(block_b * groups_per_seq, -1)          # (R, G) exact

    # Broadcast each position's probability across its F lanes via a tiny MXU
    # matmul (no cross-lane VPU/XLU relayout), then the lane-dense elementwise
    # epilogue with a full-width, unmasked store.
    p_full = jnp.dot(p, expand_ref[...], preferred_element_type=jnp.float32)
    o_ref[...] = (xd * p_full).astype(o_ref.dtype)                 # (R, 128)


def attention_rowmajor_kernel(x_ref, w1_ref, b1_ref, w2_ref, o_ref,
                              *, block_b, seq_len, matmul_dtype=None):
    """Fallback path: (Bt*S, F) rows (lane-masked stores if F < 128)."""
    x = x_ref[...]                                                 # (Bt*S, F)
    xm = x if matmul_dtype is None else x.astype(matmul_dtype)
    wm = (w1_ref[...] if matmul_dtype is None
          else w1_ref[...].astype(matmul_dtype))

    # tanh(x @ W1^T + b1): contract the F axis of both operands (no wrapper
    # transpose of the PyTorch (A, F) weight layout).
    h = jnp.tanh(
        lax.dot_general(xm, wm, dimension_numbers=(((1,), (1,)), ((), ())),
                        preferred_element_type=jnp.float32)
        + b1_ref[...]
    )                                                              # (Bt*S, A)

    # N=1 second Linear: VPU multiply + lane (XLU) reduction instead of a
    # single-output-lane MXU matmul.
    s = jnp.sum(h * w2_ref[...], axis=-1, keepdims=True)           # (Bt*S, 1)

    s = s.reshape(block_b, seq_len, 1)
    m = jnp.max(s, axis=1, keepdims=True)
    e = jnp.exp(s - m)
    p = e / jnp.sum(e, axis=1, keepdims=True)                      # exact softmax
    p = p.reshape(block_b * seq_len, 1)

    o_ref[...] = (x * p).astype(o_ref.dtype)


# ---------------------------------------------------------------------------
# Block sizing
# ---------------------------------------------------------------------------
def _choose_block_b(batch, rows_per_batch, bytes_per_row, *,
                    vmem_budget_bytes=8 * _MIB, min_blocks=4):
    """Pick how many batch elements each grid step processes.

    Rules (from the perf review):
      * tiny problems -> a single block (grid=(1,)), no pipeline overhead;
      * otherwise the largest block that (a) keeps double-buffered in/out plus
        intermediates under ~8 MiB of VMEM (safe on v5e's 16 MiB scoped default
        and v7x's 64 MiB physical), (b) keeps block rows a multiple of 8
        sublanes, and (c) leaves >= min_blocks grid steps so each TensorCore
        gets a pipelined stream of work.
    """
    total_rows = batch * rows_per_batch
    budget_rows = max(rows_per_batch, vmem_budget_bytes // (5 * bytes_per_row))
    if total_rows <= budget_rows and (
            total_rows * bytes_per_row <= (1 << 20) or batch < min_blocks):
        return batch                                # single-block fast path
    fitting, preferred = [], []
    for bb in range(1, batch + 1):
        if batch % bb:
            continue
        rows = bb * rows_per_batch
        nblocks = batch // bb
        if nblocks > 1 and rows % 8 != 0:           # (8,128) sublane constraint
            continue
        if rows > budget_rows:
            continue
        fitting.append(bb)
        if nblocks >= min_blocks:
            preferred.append(bb)
    if preferred:
        return max(preferred)
    if fitting:
        return max(fitting)
    # Nothing fits the budget (very long sequences): run single-block and let
    # the wrapper's explicit VMEM-footprint assert fail with a clear message.
    return batch


# ---------------------------------------------------------------------------
# Wrappers
# ---------------------------------------------------------------------------
def _attention_dense(x, w1, b1, w2, *, block_b=None, matmul_dtype=None):
    B, S, F = x.shape
    A = w1.shape[0]
    group = LANES // F                    # sequence positions packed per row
    rows_per_b = S // group               # lane-dense rows per batch element
    total_rows = B * rows_per_b
    ga = group * A

    f32 = jnp.float32
    eye_g = jnp.eye(group, dtype=f32)
    # Wrapper-side layout plumbing: fold the per-position Linear layers into
    # lane-dense constant operands so the kernel never relayouts data.
    wblk = jnp.kron(eye_g, jnp.transpose(w1).astype(f32))          # (128, G*A)
    bias = jnp.tile(b1.astype(f32), group).reshape(1, ga)          # (1, G*A)
    w2sel = jnp.kron(eye_g, w2.astype(f32).reshape(A, 1))          # (G*A, G)
    expand = jnp.kron(eye_g, jnp.ones((1, F), f32))                # (G, 128)

    xd = x.reshape(total_rows, LANES)     # free XLA reshape, lane-dense slab

    bytes_per_row = LANES * 4             # f32, no lane padding on this path
    if block_b is None:
        block_b = _choose_block_b(B, rows_per_b, bytes_per_row)
    assert B % block_b == 0, "block_b must divide the batch"
    num_blocks = B // block_b
    rows = block_b * rows_per_b
    assert num_blocks == 1 or rows % 8 == 0, (
        "block rows must be a multiple of 8 when using more than one block")

    # x + out double-buffered, plus f32 intermediates (h, scores, p_full).
    step_bytes = 2 * 2 * rows * bytes_per_row + rows * (ga + group + LANES) * 4
    vmem_limit = int(min(max(2 * step_bytes, 16 * _MIB), 32 * _MIB))
    assert step_bytes <= vmem_limit, (
        f"per-step VMEM footprint {step_bytes} B exceeds {vmem_limit} B; "
        "reduce block_b (very long sequences need a tiled/online softmax)")

    kernel = functools.partial(attention_dense_kernel, block_b=block_b,
                               groups_per_seq=rows_per_b,
                               matmul_dtype=matmul_dtype)

    cost = pl.CostEstimate(
        flops=int(2 * total_rows * (LANES * ga + ga * group + group * LANES)
                  + total_rows * LANES),
        transcendentals=int(total_rows * (ga + group)),
        bytes_accessed=int(2 * total_rows * LANES * 4
                           + (wblk.size + bias.size + w2sel.size + expand.size) * 4),
    )

    out = pl.pallas_call(
        kernel,
        out_shape=jax.ShapeDtypeStruct((total_rows, LANES), x.dtype),
        grid_spec=pltpu.PrefetchScalarGridSpec(
            num_scalar_prefetch=0,
            grid=(num_blocks,),
            in_specs=[
                pl.BlockSpec((rows, LANES), lambda i: (i, 0)),
                pl.BlockSpec((LANES, ga), lambda i: (0, 0)),
                pl.BlockSpec((1, ga), lambda i: (0, 0)),
                pl.BlockSpec((ga, group), lambda i: (0, 0)),
                pl.BlockSpec((group, LANES), lambda i: (0, 0)),
            ],
            out_specs=pl.BlockSpec((rows, LANES), lambda i: (i, 0)),
        ),
        compiler_params=pltpu.CompilerParams(
            # Only claim the second TensorCore when every core gets >= 2
            # pipelined steps; otherwise keep one deeper per-core pipeline.
            dimension_semantics=("parallel",) if num_blocks >= 4 else ("arbitrary",),
            vmem_limit_bytes=vmem_limit,
        ),
        cost_estimate=cost,
    )(xd, wblk, bias, w2sel, expand)
    return out.reshape(B, S, F)


def _attention_rowmajor(x, w1, b1, w2, *, block_b=None, matmul_dtype=None):
    B, S, F = x.shape
    A = w1.shape[0]

    x2 = x.reshape(B * S, F)
    b1r = b1.astype(jnp.float32).reshape(1, A)
    w2r = w2.astype(jnp.float32).reshape(1, A)

    f_pad = -(-F // LANES) * LANES        # VMEM tiles pad the minor dim to 128
    a_pad = -(-A // LANES) * LANES
    bytes_per_row = f_pad * 4
    if block_b is None:
        block_b = _choose_block_b(B, S, bytes_per_row)
    assert B % block_b == 0, "block_b must divide the batch"
    num_blocks = B // block_b
    rows = block_b * S
    assert num_blocks == 1 or rows % 8 == 0, (
        "block_b * S must be a multiple of 8 when using more than one block")

    step_bytes = 2 * 2 * rows * bytes_per_row + rows * (a_pad + LANES) * 4
    vmem_limit = int(min(max(2 * step_bytes, 16 * _MIB), 32 * _MIB))
    assert step_bytes <= vmem_limit, (
        f"per-step VMEM footprint {step_bytes} B exceeds {vmem_limit} B; "
        "reduce block_b (very long sequences need a tiled/online softmax)")

    kernel = functools.partial(attention_rowmajor_kernel, block_b=block_b,
                               seq_len=S, matmul_dtype=matmul_dtype)

    n_rows = B * S
    cost = pl.CostEstimate(
        flops=int(2 * n_rows * F * A + 3 * n_rows * A + 2 * n_rows * F),
        transcendentals=int(n_rows * (A + 1)),
        bytes_accessed=int(2 * n_rows * F * 4 + (A * F + 2 * A) * 4),
    )

    out2 = pl.pallas_call(
        kernel,
        out_shape=jax.ShapeDtypeStruct((n_rows, F), x.dtype),
        grid_spec=pltpu.PrefetchScalarGridSpec(
            num_scalar_prefetch=0,
            grid=(num_blocks,),
            in_specs=[
                pl.BlockSpec((rows, F), lambda i: (i, 0)),
                pl.BlockSpec((A, F), lambda i: (0, 0)),
                pl.BlockSpec((1, A), lambda i: (0, 0)),
                pl.BlockSpec((1, A), lambda i: (0, 0)),
            ],
            out_specs=pl.BlockSpec((rows, F), lambda i: (i, 0)),
        ),
        compiler_params=pltpu.CompilerParams(
            dimension_semantics=("parallel",) if num_blocks >= 4 else ("arbitrary",),
            vmem_limit_bytes=vmem_limit,
        ),
        cost_estimate=cost,
    )(x2, w1, b1r, w2r)
    return out2.reshape(B, S, F)


def attention_forward(x, w1, b1, w2, *, block_b=None, matmul_dtype=None):
    """x: (B, S, F); w1: (A, F); b1: (A,); w2: (1, A)  (PyTorch layouts).

    `matmul_dtype=jnp.bfloat16` casts the MXU matmul operands (native MXU
    input on v6e/v7x; f32 accumulation kept); default None keeps f32 parity.
    """
    B, S, F = x.shape
    if F <= LANES and LANES % F == 0 and S % (LANES // F) == 0:
        return _attention_dense(x, w1, b1, w2, block_b=block_b,
                                matmul_dtype=matmul_dtype)
    return _attention_rowmajor(x, w1, b1, w2, block_b=block_b,
                               matmul_dtype=matmul_dtype)


def attention_reference(x, w1, b1, w2):
    """Pure-JAX reference matching the PyTorch module exactly."""
    h = jnp.tanh(jnp.einsum("bsf,af->bsa", x, w1) + b1)        # (B, S, A)
    s = jnp.einsum("bsa,oa->bso", h, w2)                       # (B, S, 1)
    return x * jax.nn.softmax(s, axis=1)


# ---------------------------------------------------------------------------
# Self-test
# ---------------------------------------------------------------------------
if __name__ == "__main__":
    root = jax.random.PRNGKey(0)

    def make_case(seed, B, S, F, A):
        kx, kw1, kb1, kw2 = jax.random.split(jax.random.fold_in(root, seed), 4)
        x = jax.random.normal(kx, (B, S, F), dtype=jnp.float32)
        bound1 = 1.0 / float(F) ** 0.5
        w1 = jax.random.uniform(kw1, (A, F), minval=-bound1, maxval=bound1,
                                dtype=jnp.float32)
        b1 = jax.random.uniform(kb1, (A,), minval=-bound1, maxval=bound1,
                                dtype=jnp.float32)
        bound2 = 1.0 / float(A) ** 0.5
        w2 = jax.random.uniform(kw2, (1, A), minval=-bound2, maxval=bound2,
                                dtype=jnp.float32)
        return x, w1, b1, w2

    cases = [
        # (name, seed, B, S, F, A)
        ("tiny-single-block", 0, 2, 8, 32, 16),        # module default shapes
        ("pipelined-lane-dense", 1, 64, 256, 32, 16),  # 4 steps of (1024,128)
        ("rowmajor-fallback", 2, 2, 8, 48, 16),        # F does not divide 128
    ]
    for name, seed, B, S, F, A in cases:
        x, w1, b1, w2 = make_case(seed, B, S, F, A)
        out = jax.block_until_ready(attention_forward(x, w1, b1, w2))
        ref = attention_reference(x, w1, b1, w2)
        assert out.shape == (B, S, F), name
        assert jnp.allclose(out, ref, atol=2e-3, rtol=2e-3), f"mismatch: {name}"

    print("KERNEL_OK")
</pallas_src>

<mosaic_0001>
module attributes {stable_mosaic.version = 11 : i64} {
  func.func @attention_dense_kernel(%arg0: i32, %arg1: memref<4x128xf32, #tpu.memory_space<vmem>>, %arg2: memref<128x64xf32, #tpu.memory_space<vmem>>, %arg3: memref<1x64xf32, #tpu.memory_space<vmem>>, %arg4: memref<64x4xf32, #tpu.memory_space<vmem>>, %arg5: memref<4x128xf32, #tpu.memory_space<vmem>>, %arg6: memref<4x128xf32, #tpu.memory_space<vmem>>) attributes {dimension_semantics = [#tpu.dimension_semantics<arbitrary>], iteration_bounds = array<i64: 1>, scalar_prefetch = 0 : i64, scratch_operands = 0 : i64, tpu.core_type = #tpu.core_type<tc>, window_params = [{transform_indices = @transform_0, window_bounds = array<i64: 4, 128>}, {pipeline_mode = #tpu.pipeline_mode<synchronous>, transform_indices = @transform_1, window_bounds = array<i64: 128, 64>}, {pipeline_mode = #tpu.pipeline_mode<synchronous>, transform_indices = @transform_2, window_bounds = array<i64: 1, 64>}, {pipeline_mode = #tpu.pipeline_mode<synchronous>, transform_indices = @transform_3, window_bounds = array<i64: 64, 4>}, {pipeline_mode = #tpu.pipeline_mode<synchronous>, transform_indices = @transform_4, window_bounds = array<i64: 4, 128>}, {transform_indices = @transform_5, window_bounds = array<i64: 4, 128>}]} {
    %c0 = arith.constant 0 : index
    %c0_0 = arith.constant 0 : index
    %0 = vector.load %arg1[%c0, %c0_0] : memref<4x128xf32, #tpu.memory_space<vmem>>, vector<4x128xf32>
    %c0_1 = arith.constant 0 : index
    %c0_2 = arith.constant 0 : index
    %1 = vector.load %arg2[%c0_1, %c0_2] : memref<128x64xf32, #tpu.memory_space<vmem>>, vector<128x64xf32>
    %cst = arith.constant dense<0.000000e+00> : vector<4x64xf32>
    %2 = tpu.matmul %0, %1, %cst {dimension_numbers = #tpu.dot_dimension_numbers<[1], [0], [0], [1], [0, 0, 1, 1], [], []>} : vector<4x128xf32>, vector<128x64xf32>, vector<4x64xf32> -> vector<4x64xf32>
    %c0_3 = arith.constant 0 : index
    %c0_4 = arith.constant 0 : index
    %3 = vector.load %arg3[%c0_3, %c0_4] : memref<1x64xf32, #tpu.memory_space<vmem>>, vector<1x64xf32>
    %4 = vector.broadcast %3 : vector<1x64xf32> to vector<4x64xf32>
    %5 = arith.addf %2, %4 : vector<4x64xf32>
    %6 = math.tanh %5 : vector<4x64xf32>
    %c0_5 = arith.constant 0 : index
    %c0_6 = arith.constant 0 : index
    %7 = vector.load %arg4[%c0_5, %c0_6] : memref<64x4xf32, #tpu.memory_space<vmem>>, vector<64x4xf32>
    %cst_7 = arith.constant dense<0.000000e+00> : vector<4x4xf32>
    %8 = tpu.matmul %6, %7, %cst_7 {dimension_numbers = #tpu.dot_dimension_numbers<[1], [0], [0], [1], [0, 0, 1, 1], [], []>} : vector<4x64xf32>, vector<64x4xf32>, vector<4x4xf32> -> vector<4x4xf32>
    %9 = vector.shape_cast %8 : vector<4x4xf32> to vector<2x2x4xf32>
    %cst_8 = arith.constant dense<0xFF800000> : vector<2x2xf32>
    %10 = vector.multi_reduction <maximumf>, %9, %cst_8 [2] : vector<2x2x4xf32> to vector<2x2xf32>
    %11 = vector.shape_cast %10 : vector<2x2xf32> to vector<2x2x1xf32>
    %cst_9 = arith.constant dense<0xFF800000> : vector<2x1xf32>
    %12 = vector.multi_reduction <maximumf>, %11, %cst_9 [1] : vector<2x2x1xf32> to vector<2x1xf32>
    %13 = vector.shape_cast %12 : vector<2x1xf32> to vector<2x1x1xf32>
    %14 = vector.broadcast %13 : vector<2x1x1xf32> to vector<2x2x4xf32>
    %15 = arith.subf %9, %14 : vector<2x2x4xf32>
    %16 = math.exp %15 : vector<2x2x4xf32>
    %cst_10 = arith.constant dense<0.000000e+00> : vector<2x2xf32>
    %17 = vector.multi_reduction <add>, %16, %cst_10 [2] : vector<2x2x4xf32> to vector<2x2xf32>
    %18 = vector.shape_cast %17 : vector<2x2xf32> to vector<2x2x1xf32>
    %cst_11 = arith.constant dense<0.000000e+00> : vector<2x1xf32>
    %19 = vector.multi_reduction <add>, %18, %cst_11 [1] : vector<2x2x1xf32> to vector<2x1xf32>
    %20 = vector.shape_cast %19 : vector<2x1xf32> to vector<2x1x1xf32>
    %21 = vector.broadcast %20 : vector<2x1x1xf32> to vector<2x2x4xf32>
    %22 = arith.divf %16, %21 : vector<2x2x4xf32>
    %23 = vector.shape_cast %22 : vector<2x2x4xf32> to vector<4x4xf32>
    %c0_12 = arith.constant 0 : index
    %c0_13 = arith.constant 0 : index
    %24 = vector.load %arg5[%c0_12, %c0_13] : memref<4x128xf32, #tpu.memory_space<vmem>>, vector<4x128xf32>
    %cst_14 = arith.constant dense<0.000000e+00> : vector<4x128xf32>
    %25 = tpu.matmul %23, %24, %cst_14 {dimension_numbers = #tpu.dot_dimension_numbers<[1], [0], [0], [1], [0, 0, 1, 1], [], []>} : vector<4x4xf32>, vector<4x128xf32>, vector<4x128xf32> -> vector<4x128xf32>
    %26 = arith.mulf %0, %25 : vector<4x128xf32>
    %c0_15 = arith.constant 0 : index
    %c0_16 = arith.constant 0 : index
    %27 = vector.load %arg6[%c0_15, %c0_16] : memref<4x128xf32, #tpu.memory_space<vmem>>, vector<4x128xf32>
    tpu.vector_store %arg6[%c0_15, %c0_16], %26 {strides = array<i32>} : memref<4x128xf32, #tpu.memory_space<vmem>>, vector<4x128xf32>,
    return
  }
  func.func @transform_0(%arg0: i32) -> (i32, i32) {
    %c0_i32 = arith.constant 0 : i32
    %c0_i32_0 = arith.constant 0 : i32
    return %arg0, %c0_i32 : i32, i32
  }
  func.func @transform_1(%arg0: i32) -> (i32, i32) {
    %c0_i32 = arith.constant 0 : i32
    %c0_i32_0 = arith.constant 0 : i32
    %c0_i32_1 = arith.constant 0 : i32
    return %c0_i32, %c0_i32_0 : i32, i32
  }
  func.func @transform_2(%arg0: i32) -> (i32, i32) {
    %c0_i32 = arith.constant 0 : i32
    %c0_i32_0 = arith.constant 0 : i32
    %c0_i32_1 = arith.constant 0 : i32
    return %c0_i32, %c0_i32_0 : i32, i32
  }
  func.func @transform_3(%arg0: i32) -> (i32, i32) {
    %c0_i32 = arith.constant 0 : i32
    %c0_i32_0 = arith.constant 0 : i32
    %c0_i32_1 = arith.constant 0 : i32
    return %c0_i32, %c0_i32_0 : i32, i32
  }
  func.func @transform_4(%arg0: i32) -> (i32, i32) {
    %c0_i32 = arith.constant 0 : i32
    %c0_i32_0 = arith.constant 0 : i32
    %c0_i32_1 = arith.constant 0 : i32
    return %c0_i32, %c0_i32_0 : i32, i32
  }
  func.func @transform_5(%arg0: i32) -> (i32, i32) {
    %c0_i32 = arith.constant 0 : i32
    %c0_i32_0 = arith.constant 0 : i32
    return %arg0, %c0_i32 : i32, i32
  }
}

</mosaic_0001>

<bundles_post_ra>
// kernel: tpu_custom_call.1
= control target key start
LH: loop header
LB: loop body
LE: loop exit
PB: predicated region body
PF: predicated region fallthrough
CT: control target
= control target key end

     0   :  { %v531_v3 = vmov 0.0|0.0   ;;  %vm532_vm0 = vmmov 0   ;;  %v533_v6 = vmov 0.0   ;;  %s694_s0 = inlined_call_operand.vmem [shape: f32[4,128], index: 0, kind: input, shape index: {}]   ;;  %s695_s1 = inlined_call_operand.vmem [shape: f32[128,64], index: 1, kind: input, shape index: {}]   ;;  %s696_s2 = inlined_call_operand.vmem [shape: f32[1,64], index: 2, kind: input, shape index: {}]   ;;  %s697_s3 = inlined_call_operand.vmem [shape: f32[64,4], index: 3, kind: input, shape index: {}]   ;;  %s698_s4 = inlined_call_operand.vmem [shape: f32[4,128], index: 4, kind: input, shape index: {}]   ;;  %s699_s5 = inlined_call_operand.hbm [shape: f32[4,128], index: 5, kind: output, shape index: {}]  }
   0x1   :  { %v22_v0 = vld [vmem:[%s695_s1] sm:$0xff]  ;;  %v23_v1 = vld [vmem:[%s695_s1 + $0x8] sm:$0xff]  ;;  %v24_v2 = vld [vmem:[%s695_s1 + $0x10] sm:$0xff]  ;;  %456 = vmatprep.subr.bf16.mxu0 %v531_v3  ;;  %429 = vmatprep.mubr.msk.f32.mxu0 %vm532_vm0, %v533_v6 }
   0x2   :  { %v457_v4 = vpack.c.bf16 %v23_v1, %v22_v0  ;;  %v25_v5 = vld [vmem:[%s695_s1 + $0x18] sm:$0xff]  ;;  %480 = vmatprep.subr.bf16.mxu1 %v531_v3  ;;  %448 = vmatprep.mubr.msk.f32.mxu1 %vm532_vm0, %v533_v6  ;;  %v26_v8 = vld [vmem:[%s695_s1 + $0x20] sm:$0xff]  ;;  %v27_v9 = vld [vmem:[%s695_s1 + $0x28] sm:$0xff] }
   0x3   :  { %v460_v7 = vpack.c.bf16 %v25_v5, %v24_v2  ;;  %v116_v10 = vld [vmem:[%s697_s3] sm:$0xff]  ;;  %v117_v11 = vld [vmem:[%s697_s3 + $0x8] sm:$0xff] }
   0x4   :  { %458 = vmatpush3.bf16.msra.mxu0 %v457_v4 }
   0x5   :  { %459 = vmatprep.subr.bf16.mxu0 %v531_v3 }
   0x6   :  { %10 = vsyncpa [#allocation3], 0  ;;  %v463_v12 = vpack.c.bf16 %v27_v9, %v26_v8  ;;  %v481_v13 = vpack.c.bf16 %v117_v11, %v116_v10  ;;  %v28_v14 = vld [vmem:[%s695_s1 + $0x30] sm:$0xff]  ;;  %v29_v15 = vld [vmem:[%s695_s1 + $0x38] sm:$0xff]  ;;  %vm124_vm1 = vcmask 523264   ;;  %v202_v46 = vlaneseq }
   0x7   :  { %v466_v16 = vpack.c.bf16 %v29_v15, %v28_v14  ;;  %v30_v17 = vld [vmem:[%s695_s1 + $0x40] sm:$0xff]  ;;  %v31_v18 = vld [vmem:[%s695_s1 + $0x48] sm:$0xff]  ;;  %v32_v20 = vld [vmem:[%s695_s1 + $0x50] sm:$0xff]  ;;  %v534_v44 = vmov 1983009808   ;;  %vm209_vm2 = vcmask 25600  }
   0x8   :  { %461 = vmatpush3.bf16.msra.mxu0 %v460_v7  ;;  %482 = vmatpush3.bf16.msra.mxu1 %v481_v13  ;;  %v469_v19 = vpack.c.bf16 %v31_v18, %v30_v17  ;;  %v33_v21 = vld [vmem:[%s695_s1 + $0x58] sm:$0xff]  ;;  %v34_v23 = vld [vmem:[%s695_s1 + $0x60] sm:$0xff]  ;;  %v35_v24 = vld [vmem:[%s695_s1 + $0x68] sm:$0xff]  ;;  %v200_v45 = vunpack.c.l.s4 %v534_v44  ;;  %v203_v48 = vshrl.u32 %v202_v46, 7  ;;  %vm216_vm3 = vcmask 1041408  }
   0x9   :  { %462 = vmatprep.subr.bf16.mxu0 %v531_v3  ;;  %483 = vmatprep.subr.bf16.mxu1 %v531_v3  ;;  %v472_v22 = vpack.c.bf16 %v33_v21, %v32_v20  ;;  %v475_v25 = vpack.c.bf16 %v35_v24, %v34_v23  ;;  %v36_v26 = vld [vmem:[%s695_s1 + $0x70] sm:$0xff]  ;;  %v37_v27 = vld [vmem:[%s695_s1 + $0x78] sm:$0xff]  ;;  %v637_v29 = vld [vmem:[%s694_s0] sm:$0xf]  ;;  %vm275_vm4 = vcmask 1043456   ;;  %vm272_vm5 = vcmask 31744  }
   0xa   :  { %v478_v28 = vpack.c.bf16 %v37_v27, %v36_v26  ;;  %v118_v30 = vld [vmem:[%s697_s3 + $0x10] sm:$0xff]  ;;  %v119_v31 = vld [vmem:[%s697_s3 + $0x18] sm:$0xff]  ;;  %v120_v33 = vld [vmem:[%s697_s3 + $0x20] sm:$0xff]  ;;  %v201_v47 = vunpack.c.0.s8 %v200_v45 }
   0xb   :  { %v484_v32 = vpack.c.bf16 %v119_v31, %v118_v30  ;;  %v121_v34 = vld [vmem:[%s697_s3 + $0x28] sm:$0xff]  ;;  %v122_v36 = vld [vmem:[%s697_s3 + $0x30] sm:$0xff]  ;;  %v123_v37 = vld [vmem:[%s697_s3 + $0x38] sm:$0xff] }
   0xc   :  { %464 = vmatpush3.bf16.msra.mxu0 %v463_v12  ;;  %v487_v35 = vpack.c.bf16 %v121_v34, %v120_v33  ;;  %v490_v38 = vpack.c.bf16 %v123_v37, %v122_v36  ;;  %v365_v39 = vld [vmem:[%s696_s2] ss:$0 sm:$0xff]  ;;  %v666_v49 = vsub.s32 %v201_v47, %v203_v48 }
   0xd   :  { %465 = vmatprep.subr.bf16.mxu0 %v531_v3  ;;  %485 = vmatpush3.bf16.msra.mxu1 %v484_v32 }
   0xe   :  { %486 = vmatprep.subr.bf16.mxu1 %v531_v3 }
  0x10   :  { %467 = vmatpush3.bf16.msra.mxu0 %v466_v16  ;;  %v261_v16 = vld [vmem:[%s698_s4] sm:$0xf]  ;;  %s535_s4 = smov [#allocation2]  }
  0x11   :  { %468 = vmatprep.subr.bf16.mxu0 %v531_v3  ;;  %488 = vmatpush3.bf16.msra.mxu1 %v487_v35  ;;  %s357_s18 = sshll.u32 %s535_s4, 4  ;;  %s358_s18 = int_to_ptr.vmem [resolvable:$true] %s357_s18 }
  0x12   :  { %489 = vmatprep.subr.bf16.mxu1 %v531_v3  ;;  %s507_s19 = scalar_lea.vmem %s358_s18, 64  ;;  %p512_p1 = scmp.lt.s32.totalorder %s358_s18, %s358_s18 }
  0x13   :  { %p508_p0 = scmp.ne.s32.totalorder %s358_s18, %s507_s19  ;;  %p513_p2 = scmp.lt.s32.totalorder %s507_s19, %s507_s19 }
  0x14   :  { %470 = vmatpush3.bf16.msra.mxu0 %v469_v19 }
  0x15   :  { %471 = vmatprep.subr.bf16.mxu0 %v531_v3  ;;  %491 = vmatpush3.bf16.msra.mxu1 %v490_v38  ;;  %p514_p3 = por %p513_p2, %p512_p1 }
  0x16   :  { %451 = vmatprep.subr.mxu1 %v533_v6 }
  0x17   :  { %p515_p4 = pnand %p514_p3, %p508_p0 }
  0x18   :  { %473 = vmatpush3.bf16.msra.mxu0 %v472_v22 }
  0x19   :  { %474 = vmatprep.subr.bf16.mxu0 %v531_v3 }
  0x1c   :  { %476 = vmatpush3.bf16.msra.mxu0 %v475_v25 }
  0x1d   :  { %477 = vmatprep.subr.bf16.mxu0 %v531_v3 }
  0x20   :  { %479 = vmatpush3.bf16.msra.mxu0 %v478_v28 }
  0x23   :  { %430 = vmatmul.mubr.f32.vlgmr.msra.gmra.mrb[0].mxu0 %v637_v29 }
  0xf6   :  { %v111_v40 = vpop.f32.mrb[0].mxu0 }
  0xf7   :  { %v112_v41 = vadd.f32 %v365_v39, %v111_v40  ;;  %v431_v42 = vpop.f32.mrb[1].mxu0 }
  0xf9   :  { %497 = vtanh.f32 %v112_v41 }
 0x103   :  { %v498_v43 = vpop.eup %497 }
 0x104   :  { %449 = vmatmul.mubr.msk.f32.vlgmr.msra.gmra.mrb[0].mxu1 %vm124_vm1, %v498_v43 }
 0x105   :  { %453 = vmatprep.mubr.msk.f32.mxu1 %vm532_vm0, %v533_v6  ;;  %452 = vmatpush3.msk.msra.mxu1 %vm275_vm4, %v261_v16 }
 0x1d7   :  { %v194_v50 = vpop.f32.mrb[0].mxu1 }
 0x1d8   :  { %v205_v51 = vrot.slane %v194_v50, %v666_v49  ;;  %v450_v52 = vpop.f32.mrb[1].mxu1 }
 0x1da   :  { %v210_v53 = vsel %vm209_vm2, %v205_v51, -inf  ;;  %v206_v54 = vcombine.high %v205_v51, %v205_v51 }
 0x1db   :  { %211 = vmax.xlane.f32.xlu0 %v210_v53 }
 0x1dc   :  { %v213_v55 = vsel %vm209_vm2, %v206_v54, -inf }
 0x1df   :  { %214 = vmax.xlane.f32.xlu0 %v213_v55 }
 0x268   :  { %v212_v56 = vpop.xlane.xlu0 %211 }
 0x269   :  { %v217_v57 = vsel %vm216_vm3, %v212_v56, -inf }
 0x26a   :  { %v218_v58 = vrot.slane %v217_v57, 4 }
 0x26c   :  { %v219_v59 = vmax.f32 %v217_v57, %v218_v58  ;;  %v215_v60 = vpop.xlane.xlu0 %214 }
 0x26d   :  { %v224_v61 = vsel %vm216_vm3, %v215_v60, -inf }
 0x26e   :  { %v220_v62 = vrot.slane %v219_v59, 2  ;;  %v225_v63 = vrot.slane %v224_v61, 4 }
 0x270   :  { %v221_v0 = vmax.f32 %v219_v59, %v220_v62  ;;  %v226_v1 = vmax.f32 %v224_v61, %v225_v63 }
 0x272   :  { %v222_v2 = vrot.slane %v221_v0, 1  ;;  %v227_v3 = vrot.slane %v226_v1, 2 }
 0x274   :  { %v223_v4 = vmax.f32 %v221_v0, %v222_v2  ;;  %v228_v5 = vmax.f32 %v226_v1, %v227_v3 }
 0x276   :  { %v231_v6 = vsub.f32 %v205_v51, %v223_v4  ;;  %v229_v7 = vrot.slane %v228_v5, 1 }
 0x278   :  { %v233_v8 = vmul.f32 1.442695, %v231_v6  ;;  %v230_v9 = vmax.f32 %v228_v5, %v229_v7 }
 0x27a   :  { %499 = vpow2.f32 %v233_v8  ;;  %v232_v10 = vsub.f32 %v206_v54, %v230_v9 }
 0x27c   :  { %v235_v11 = vmul.f32 1.442695, %v232_v10 }
 0x27e   :  { %501 = vpow2.f32 %v235_v11 }
 0x284   :  { %v500_v12 = vpop.eup %499 }
 0x285   :  { %v237_v13 = vsel %vm209_vm2, %v500_v12, 0.0 }
 0x286   :  { %238 = vadd.xlane.f32.xlu1 %v237_v13 }
 0x288   :  { %v502_v14 = vpop.eup %501 }
 0x289   :  { %v240_v15 = vsel %vm209_vm2, %v502_v14, 0.0 }
 0x28a   :  { %241 = vadd.xlane.f32.xlu1 %v240_v15 }
 0x313   :  { %v239_v17 = vpop.xlane.xlu1 %238 }
 0x314   :  { %v243_v18 = vsel %vm216_vm3, %v239_v17, 0.0 }
 0x315   :  { %v244_v19 = vrot.slane %v243_v18, 4 }
 0x317   :  { %v245_v20 = vadd.f32 %v244_v19, %v243_v18  ;;  %v242_v21 = vpop.xlane.xlu1 %241 }
 0x318   :  { %v250_v22 = vsel %vm216_vm3, %v242_v21, 0.0 }
 0x319   :  { %v246_v23 = vrot.slane %v245_v20, 2  ;;  %v251_v24 = vrot.slane %v250_v22, 4 }
 0x31b   :  { %v247_v25 = vadd.f32 %v246_v23, %v245_v20  ;;  %v252_v26 = vadd.f32 %v251_v24, %v250_v22 }
 0x31d   :  { %v248_v27 = vrot.slane %v247_v25, 1  ;;  %v253_v28 = vrot.slane %v252_v26, 2 }
 0x31f   :  { %v249_v30 = vadd.f32 %v248_v27, %v247_v25  ;;  %v254_v31 = vadd.f32 %v253_v28, %v252_v26 }
 0x321   :  { %v255_v32 = vrot.slane %v254_v31, 1  ;;  %503 = vrcp.f32 %v249_v30 }
 0x323   :  { %v256_v33 = vadd.f32 %v255_v32, %v254_v31 }
 0x325   :  { %505 = vrcp.f32 %v256_v33 }
 0x32b   :  { %v504_v34 = vpop.eup %503 }
 0x32c   :  { %v258_v36 = vmul.f32 %v504_v34, %v500_v12 }
 0x32f   :  { %v506_v35 = vpop.eup %505 }
 0x330   :  { %v260_v37 = vmul.f32 %v506_v35, %v502_v14 }
 0x332   :  { %v264_v38 = vcombine.low %v258_v36, %v260_v37 }
 0x334   :  { %v271_v39 = vrot.slane %v264_v38, %v666_v49 }
 0x336   :  { %454 = vmatmul.mubr.msk.f32.vlgmr.msra.gmra.mrb[2].mxu1 %vm272_vm5, %v271_v39 }
 0x409   :  { %v345_v40 = vpop.f32.mrb[2].mxu1 }
 0x40a   :  { %v349_v41 = vmul.f32 %v345_v40, %v637_v29  ;;  %v455_v42 = vpop.f32.mrb[3].mxu1 }
 0x40c   :  { %350 = vst [vmem:[#allocation2] sm:$0xf] %v349_v41 }
 0x40d   :  { %518 = shalt.err (!%p515_p4)
}
 0x40e   :  { %s519_s22 = scalar_lea.hbm %s699_s5, 64 }
 0x40f   :  { %p520_p5 = scmp.ne.s32.totalorder %s699_s5, %s519_s22  ;;  %p523_p6 = scmp.lt.u32.totalorder %s519_s22, %s699_s5 }
 0x411   :  { %p525_p7 = pnand %p523_p6, %p520_p5 }
 0x413   :  { %528 = shalt.err (!%p525_p7)
}
 0x414   :  { %360 = dma.vmem_to_hbm [thread:$0]  %s358_s18, 64, %s699_s5, [#allocation3]  }
 0x415   :  { %529 = dma.done.wait [#allocation3], 64  }
 0x416   :  { %530 = vsyncadd [#allocation3], 4294967232 }
 0x417   :  { %364 = vsyncpa [#allocation3], 1 }

</bundles_post_ra>
